<compile_context>
chip_gen: v6e
topology: v6e:2x2x1
jax: 0.10.0
libtpu: 0.0.40
codegen_flags: <defaults>
</compile_context>

<pallas_src>
import functools

import jax
import jax.numpy as jnp
from jax.experimental import pallas as pl
from jax.experimental.pallas import tpu as pltpu

_LANE = 128


def dense_moe_kernel(x_ref, w_ref, b_ref, out_ref, acc_ref, *, num_experts, d_out_pad):
    k = pl.program_id(1)

    @pl.when(k == 0)
    def _init():
        acc_ref[...] = jnp.zeros_like(acc_ref)

    # Single fused matmul covers all expert slabs + the gate slab.
    acc_ref[...] += jnp.dot(x_ref[...], w_ref[...],
                            preferred_element_type=jnp.float32)

    @pl.when(k == pl.num_programs(1) - 1)
    def _finalize():
        y = acc_ref[...] + b_ref[...]                       # (tb, E*d_out_pad + 128), f32

        # Gate softmax over the (lane-aligned) 128-wide gate slab; padded lanes
        # carry bias -1e30 so exp() underflows to 0 and softmax stays exact.
        gate_logits = y[:, num_experts * d_out_pad:]        # (tb, 128)
        m = jnp.max(gate_logits, axis=-1, keepdims=True)
        p = jnp.exp(gate_logits - m)
        gate = p * pl.reciprocal(jnp.sum(p, axis=-1, keepdims=True), approx=True)

        # Weighted sum over expert slabs (each slab is 128-lane aligned).
        out = jnp.zeros((y.shape[0], d_out_pad), jnp.float32)
        for e in range(num_experts):                        # E is small & static
            slab = y[:, e * d_out_pad:(e + 1) * d_out_pad]  # (tb, d_out_pad)
            out = out + gate[:, e:e + 1] * slab
        out_ref[...] = out.astype(out_ref.dtype)


def dense_moe(x, gate_w, gate_b, expert_w, expert_b, *,
              compute_dtype=jnp.bfloat16, out_dtype=None,
              tb_max=256, tk_max=512):
    """x: (B, D_in); gate_w: (D_in, E); gate_b: (E,) or (1, E);
    expert_w: (E, D_in, D_out); expert_b: (E, D_out)."""
    B, D_in = x.shape
    E, _, D_out = expert_w.shape
    if out_dtype is None:
        out_dtype = x.dtype

    d_out_pad = ((D_out + _LANE - 1) // _LANE) * _LANE      # expert slab width
    gate_pad = max(_LANE, ((E + _LANE - 1) // _LANE) * _LANE)
    n_fused = E * d_out_pad + gate_pad

    # ---- build fused, lane-dense weight / bias (wrapper-side layout plumbing) ----
    w_exp = jnp.pad(expert_w, ((0, 0), (0, 0), (0, d_out_pad - D_out)))      # (E, D_in, d_out_pad)
    w_exp = jnp.transpose(w_exp, (1, 0, 2)).reshape(D_in, E * d_out_pad)     # (D_in, E*d_out_pad)
    w_gate = jnp.pad(gate_w, ((0, 0), (0, gate_pad - E)))                    # (D_in, gate_pad)
    w_fused = jnp.concatenate([w_exp, w_gate], axis=1).astype(compute_dtype)  # (D_in, n_fused)

    b_exp = jnp.pad(expert_b, ((0, 0), (0, d_out_pad - D_out))).reshape(1, E * d_out_pad)
    b_gate = jnp.pad(jnp.reshape(gate_b, (1, E)), ((0, 0), (0, gate_pad - E)),
                     constant_values=-1e30)  # padded gate lanes -> softmax weight 0
    b_fused = jnp.concatenate([b_exp, b_gate], axis=1).astype(jnp.float32)   # (1, n_fused)

    x_c = x.astype(compute_dtype)

    # ---- tiling: B on sublanes, D_in as the (last) reduction grid axis ----
    tb = tb_max if (B > tb_max and B % tb_max == 0) else B
    tk = tk_max if (D_in > tk_max and D_in % tk_max == 0) else D_in
    grid = (B // tb, D_in // tk)
    # TODO(synk): tile the fused-N axis (replicating the gate slab per N-tile) for
    # very wide E*D_out where one (tk, n_fused) weight tile would not fit VMEM.

    itemsize = jnp.dtype(compute_dtype).itemsize
    vmem_need = (2 * (tb * tk + tk * n_fused + n_fused) * itemsize   # double-buffered inputs
                 + 2 * tb * d_out_pad * jnp.dtype(out_dtype).itemsize
                 + tb * n_fused * 4)                                  # f32 accumulator
    vmem_limit = min(64 * 1024 * 1024, max(32 * 1024 * 1024, int(vmem_need * 2)))

    cost = pl.CostEstimate(
        flops=2 * B * D_in * n_fused + 4 * B * E * d_out_pad,
        transcendentals=B * gate_pad,
        bytes_accessed=int(x_c.size * itemsize + w_fused.size * itemsize
                           + b_fused.size * 4
                           + B * d_out_pad * jnp.dtype(out_dtype).itemsize),
    )

    grid_spec = pltpu.PrefetchScalarGridSpec(
        num_scalar_prefetch=0,
        grid=grid,
        in_specs=[
            pl.BlockSpec((tb, tk), lambda i, k: (i, k)),          # x tile
            pl.BlockSpec((tk, n_fused), lambda i, k: (k, 0)),     # fused weight tile
            pl.BlockSpec((1, n_fused), lambda i, k: (0, 0)),      # fused bias
        ],
        out_specs=pl.BlockSpec((tb, d_out_pad), lambda i, k: (i, 0)),
        scratch_shapes=[pltpu.VMEM((tb, n_fused), jnp.float32)],
    )

    out_pad = pl.pallas_call(
        functools.partial(dense_moe_kernel, num_experts=E, d_out_pad=d_out_pad),
        out_shape=jax.ShapeDtypeStruct((B, d_out_pad), out_dtype),
        grid_spec=grid_spec,
        compiler_params=pltpu.CompilerParams(
            dimension_semantics=("parallel", "arbitrary"),
            vmem_limit_bytes=vmem_limit),
        cost_estimate=cost,
    )(x_c, w_fused, b_fused)

    return out_pad[:, :D_out]


def dense_moe_ref(x, gate_w, gate_b, expert_w, expert_b):
    """Pure-JAX reference mirroring the PyTorch forward."""
    logits = x @ gate_w + jnp.reshape(gate_b, (1, -1))                        # (B, E)
    w = jax.nn.softmax(logits, axis=-1)                                       # (B, E)
    expert_outputs = jnp.einsum('bd,edo->beo', x, expert_w) + expert_b[None]  # (B, E, D_out)
    return jnp.sum(expert_outputs * w[..., None], axis=1)                     # (B, D_out)


if __name__ == "__main__":
    B, D_in, D_out, E = 8, 32, 16, 4

    key = jax.random.PRNGKey(0)
    kx, kgw, kgb, kew, keb = jax.random.split(key, 5)

    x = jax.random.normal(kx, (B, D_in), dtype=jnp.float32)

    # Deterministic parameter init (torch.nn.Linear-style uniform bounds).
    gbound = 1.0 / (D_in ** 0.5)
    gate_w = jax.random.uniform(kgw, (D_in, E), jnp.float32, -gbound, gbound)
    gate_b = jax.random.uniform(kgb, (1, E), jnp.float32, -gbound, gbound)
    expert_w = jax.random.uniform(kew, (E, D_in, D_out), jnp.float32, -gbound, gbound)
    expert_b = jax.random.uniform(keb, (E, D_out), jnp.float32, -gbound, gbound)

    ref = dense_moe_ref(x, gate_w, gate_b, expert_w, expert_b)

    # f32 compute path (tight check).
    out_f32 = jax.block_until_ready(
        dense_moe(x, gate_w, gate_b, expert_w, expert_b, compute_dtype=jnp.float32))
    assert out_f32.shape == (B, D_out)
    assert jnp.allclose(out_f32, ref, atol=2e-3, rtol=2e-3), "f32 mismatch vs reference"

    # bf16 operands / f32 accumulation (default, perf path).
    out_bf16 = jax.block_until_ready(
        dense_moe(x, gate_w, gate_b, expert_w, expert_b, compute_dtype=jnp.bfloat16))
    assert out_bf16.shape == (B, D_out)
    assert jnp.allclose(out_bf16, ref, atol=5e-2, rtol=5e-2), "bf16 mismatch vs reference"

    print("KERNEL_OK")
</pallas_src>

<mosaic_0001>
module attributes {stable_mosaic.version = 11 : i64} {
  func.func @dense_moe_kernel(%arg0: i32, %arg1: i32, %arg2: memref<8x32xf32, #tpu.memory_space<vmem>>, %arg3: memref<32x640xf32, #tpu.memory_space<vmem>>, %arg4: memref<1x640xf32, #tpu.memory_space<vmem>>, %arg5: memref<8x128xf32, #tpu.memory_space<vmem>>, %arg6: memref<8x640xf32, #tpu.memory_space<vmem>>) attributes {dimension_semantics = [#tpu.dimension_semantics<parallel>, #tpu.dimension_semantics<arbitrary>], iteration_bounds = array<i64: 1, 1>, scalar_prefetch = 0 : i64, scratch_operands = 1 : i64, tpu.core_type = #tpu.core_type<tc>, window_params = [{transform_indices = @transform_0, window_bounds = array<i64: 8, 32>}, {transform_indices = @transform_1, window_bounds = array<i64: 32, 640>}, {pipeline_mode = #tpu.pipeline_mode<synchronous>, transform_indices = @transform_2, window_bounds = array<i64: 1, 640>}, {transform_indices = @transform_3, window_bounds = array<i64: 8, 128>}]} {
    %c0_i32 = arith.constant 0 : i32
    %0 = arith.cmpi eq, %arg1, %c0_i32 : i32
    %1 = arith.extui %0 : i1 to i32
    %c0_i32_0 = arith.constant 0 : i32
    %2 = arith.cmpi ne, %1, %c0_i32_0 : i32
    scf.if %2 {
      %cst_10 = arith.constant 0.000000e+00 : f32
      %12 = vector.broadcast %cst_10 : f32 to vector<8x640xf32>
      %c0_11 = arith.constant 0 : index
      %c0_12 = arith.constant 0 : index
      %13 = vector.load %arg6[%c0_11, %c0_12] : memref<8x640xf32, #tpu.memory_space<vmem>>, vector<8x640xf32>
      tpu.vector_store %arg6[%c0_11, %c0_12], %12 {strides = array<i32>} : memref<8x640xf32, #tpu.memory_space<vmem>>, vector<8x640xf32>,
    } else {
    }
    %c0 = arith.constant 0 : index
    %c0_1 = arith.constant 0 : index
    %3 = vector.load %arg6[%c0, %c0_1] : memref<8x640xf32, #tpu.memory_space<vmem>>, vector<8x640xf32>
    %c0_2 = arith.constant 0 : index
    %c0_3 = arith.constant 0 : index
    %4 = vector.load %arg2[%c0_2, %c0_3] : memref<8x32xf32, #tpu.memory_space<vmem>>, vector<8x32xf32>
    %c0_4 = arith.constant 0 : index
    %c0_5 = arith.constant 0 : index
    %5 = vector.load %arg3[%c0_4, %c0_5] : memref<32x640xf32, #tpu.memory_space<vmem>>, vector<32x640xf32>
    %cst = arith.constant dense<0.000000e+00> : vector<8x640xf32>
    %6 = tpu.matmul %4, %5, %cst {dimension_numbers = #tpu.dot_dimension_numbers<[1], [0], [0], [1], [0, 0, 1, 1], [], []>} : vector<8x32xf32>, vector<32x640xf32>, vector<8x640xf32> -> vector<8x640xf32>
    %7 = arith.addf %3, %6 : vector<8x640xf32>
    %c0_6 = arith.constant 0 : index
    %c0_7 = arith.constant 0 : index
    %8 = vector.load %arg6[%c0_6, %c0_7] : memref<8x640xf32, #tpu.memory_space<vmem>>, vector<8x640xf32>
    tpu.vector_store %arg6[%c0_6, %c0_7], %7 {strides = array<i32>} : memref<8x640xf32, #tpu.memory_space<vmem>>, vector<8x640xf32>,
    %c0_i32_8 = arith.constant 0 : i32
    %9 = arith.cmpi eq, %arg1, %c0_i32_8 : i32
    %10 = arith.extui %9 : i1 to i32
    %c0_i32_9 = arith.constant 0 : i32
    %11 = arith.cmpi ne, %10, %c0_i32_9 : i32
    scf.if %11 {
      %c0_10 = arith.constant 0 : index
      %c0_11 = arith.constant 0 : index
      %12 = vector.load %arg6[%c0_10, %c0_11] : memref<8x640xf32, #tpu.memory_space<vmem>>, vector<8x640xf32>
      %c0_12 = arith.constant 0 : index
      %c0_13 = arith.constant 0 : index
      %13 = vector.load %arg4[%c0_12, %c0_13] : memref<1x640xf32, #tpu.memory_space<vmem>>, vector<1x640xf32>
      %14 = vector.broadcast %13 : vector<1x640xf32> to vector<8x640xf32>
      %15 = arith.addf %12, %14 : vector<8x640xf32>
      %16 = vector.extract_strided_slice %15 {offsets = [0, 512], sizes = [8, 128], strides = [1, 1]} : vector<8x640xf32> to vector<8x128xf32>
      %cst_14 = arith.constant dense<0xFF800000> : vector<8xf32>
      %17 = vector.multi_reduction <maximumf>, %16, %cst_14 [1] : vector<8x128xf32> to vector<8xf32>
      %18 = vector.shape_cast %17 : vector<8xf32> to vector<8x1xf32>
      %19 = vector.broadcast %18 : vector<8x1xf32> to vector<8x128xf32>
      %20 = arith.subf %16, %19 : vector<8x128xf32>
      %21 = math.exp %20 : vector<8x128xf32>
      %cst_15 = arith.constant dense<0.000000e+00> : vector<8xf32>
      %22 = vector.multi_reduction <add>, %21, %cst_15 [1] : vector<8x128xf32> to vector<8xf32>
      %23 = vector.shape_cast %22 : vector<8xf32> to vector<8x1xf32>
      %24 = tpu.reciprocal %23 {approx = true} : vector<8x1xf32> -> vector<8x1xf32>
      %25 = vector.broadcast %24 : vector<8x1xf32> to vector<8x128xf32>
      %26 = arith.mulf %21, %25 : vector<8x128xf32>
      %cst_16 = arith.constant 0.000000e+00 : f32
      %27 = vector.broadcast %cst_16 : f32 to vector<8x128xf32>
      %28 = vector.extract_strided_slice %15 {offsets = [0, 0], sizes = [8, 128], strides = [1, 1]} : vector<8x640xf32> to vector<8x128xf32>
      %29 = vector.extract_strided_slice %26 {offsets = [0, 0], sizes = [8, 1], strides = [1, 1]} : vector<8x128xf32> to vector<8x1xf32>
      %30 = vector.broadcast %29 : vector<8x1xf32> to vector<8x128xf32>
      %31 = arith.mulf %30, %28 : vector<8x128xf32>
      %32 = arith.addf %27, %31 : vector<8x128xf32>
      %33 = vector.extract_strided_slice %15 {offsets = [0, 128], sizes = [8, 128], strides = [1, 1]} : vector<8x640xf32> to vector<8x128xf32>
      %34 = vector.extract_strided_slice %26 {offsets = [0, 1], sizes = [8, 1], strides = [1, 1]} : vector<8x128xf32> to vector<8x1xf32>
      %35 = vector.broadcast %34 : vector<8x1xf32> to vector<8x128xf32>
      %36 = arith.mulf %35, %33 : vector<8x128xf32>
      %37 = arith.addf %32, %36 : vector<8x128xf32>
      %38 = vector.extract_strided_slice %15 {offsets = [0, 256], sizes = [8, 128], strides = [1, 1]} : vector<8x640xf32> to vector<8x128xf32>
      %39 = vector.extract_strided_slice %26 {offsets = [0, 2], sizes = [8, 1], strides = [1, 1]} : vector<8x128xf32> to vector<8x1xf32>
      %40 = vector.broadcast %39 : vector<8x1xf32> to vector<8x128xf32>
      %41 = arith.mulf %40, %38 : vector<8x128xf32>
      %42 = arith.addf %37, %41 : vector<8x128xf32>
      %43 = vector.extract_strided_slice %15 {offsets = [0, 384], sizes = [8, 128], strides = [1, 1]} : vector<8x640xf32> to vector<8x128xf32>
      %44 = vector.extract_strided_slice %26 {offsets = [0, 3], sizes = [8, 1], strides = [1, 1]} : vector<8x128xf32> to vector<8x1xf32>
      %45 = vector.broadcast %44 : vector<8x1xf32> to vector<8x128xf32>
      %46 = arith.mulf %45, %43 : vector<8x128xf32>
      %47 = arith.addf %42, %46 : vector<8x128xf32>
      %c0_17 = arith.constant 0 : index
      %c0_18 = arith.constant 0 : index
      %48 = vector.load %arg5[%c0_17, %c0_18] : memref<8x128xf32, #tpu.memory_space<vmem>>, vector<8x128xf32>
      tpu.vector_store %arg5[%c0_17, %c0_18], %47 {strides = array<i32>} : memref<8x128xf32, #tpu.memory_space<vmem>>, vector<8x128xf32>,
    } else {
    }
    return
  }
  func.func @transform_0(%arg0: i32, %arg1: i32) -> (i32, i32) {
    %c0_i32 = arith.constant 0 : i32
    return %arg0, %arg1 : i32, i32
  }
  func.func @transform_1(%arg0: i32, %arg1: i32) -> (i32, i32) {
    %c0_i32 = arith.constant 0 : i32
    %c0_i32_0 = arith.constant 0 : i32
    return %arg1, %c0_i32 : i32, i32
  }
  func.func @transform_2(%arg0: i32, %arg1: i32) -> (i32, i32) {
    %c0_i32 = arith.constant 0 : i32
    %c0_i32_0 = arith.constant 0 : i32
    %c0_i32_1 = arith.constant 0 : i32
    return %c0_i32, %c0_i32_0 : i32, i32
  }
  func.func @transform_3(%arg0: i32, %arg1: i32) -> (i32, i32) {
    %c0_i32 = arith.constant 0 : i32
    %c0_i32_0 = arith.constant 0 : i32
    return %arg0, %c0_i32 : i32, i32
  }
}

</mosaic_0001>

<bundles_post_ra>
// kernel: tpu_custom_call.1
= control target key start
LH: loop header
LB: loop body
LE: loop exit
PB: predicated region body
PF: predicated region fallthrough
CT: control target
= control target key end

     0   :  { %8 = vsyncpa [#allocation4], 0  ;;  %s584_s0 = inlined_call_operand.hbm [shape: f32[8,32], index: 0, kind: input, shape index: {}]   ;;  %s585_s1 = inlined_call_operand.hbm [shape: f32[32,640], index: 1, kind: input, shape index: {}]   ;;  %s586_s2 = inlined_call_operand.hbm [shape: f32[1,640], index: 2, kind: input, shape index: {}]   ;;  %s587_s3 = inlined_call_operand.hbm [shape: f32[8,128], index: 3, kind: output, shape index: {}]  }
   0x1   :  { %9 = vsyncpa [#allocation7], 0 }
   0x2   :  { %10 = vsyncpa [#allocation5], 0  ;;  %s530_s12 = smov [#allocation6]  }
   0x3   :  { %s26_s13 = sshll.u32 %s530_s12, 4  ;;  %s27_s13 = int_to_ptr.vmem [resolvable:$true] %s26_s13 }
   0x4   :  { %s452_s14 = scalar_lea.vmem %s27_s13, 2560  ;;  %p457_p1 = scmp.lt.s32.totalorder %s27_s13, %s27_s13 }
   0x5   :  { %p453_p0 = scmp.ne.s32.totalorder %s27_s13, %s452_s14  ;;  %p458_p2 = scmp.lt.s32.totalorder %s452_s14, %s452_s14 }
   0x7   :  { %p459_p3 = por %p458_p2, %p457_p1 }
   0x9   :  { %p460_p4 = pnand %p459_p3, %p453_p0 }
   0xb   :  { %463 = shalt.err (!%p460_p4)
}
   0xc   :  { %s531_s15 = smov 640   ;;  %s532_s16 = smov 40  }
   0xd   :  { %32 = dma.hbm_to_vmem [thread:$0]  %s585_s1, 2560, %s27_s13, [#allocation7], %s531_s15, %s531_s15, %s532_s16  }
   0xe   :  { %s533_s19 = smov [#allocation3]   ;;  %s534_s21 = smov [#allocation8]  }
   0xf   :  { %s17_s20 = sshll.u32 %s533_s19, 4  ;;  %s39_s22 = sshll.u32 %s534_s21, 4  ;;  %s18_s20 = int_to_ptr.vmem [resolvable:$true] %s17_s20  ;;  %s40_s22 = int_to_ptr.vmem [resolvable:$true] %s39_s22 }
  0x10   :  { %s472_s23 = scalar_lea.vmem %s18_s20, 128  ;;  %p477_p6 = scmp.lt.s32.totalorder %s18_s20, %s18_s20 }
  0x11   :  { %p473_p5 = scmp.ne.s32.totalorder %s18_s20, %s472_s23  ;;  %p478_p7 = scmp.lt.s32.totalorder %s472_s23, %s472_s23 }
  0x13   :  { %p479_p8 = por %p478_p7, %p477_p6 }
  0x15   :  { %p480_p9 = pnand %p479_p8, %p473_p5 }
  0x17   :  { %483 = shalt.err (!%p480_p9)
}
  0x18   :  { %20 = dma.hbm_to_vmem [thread:$0]  %s584_s0, 128, %s18_s20, [#allocation4]  }
  0x19   :  { %s492_s26 = scalar_lea.vmem %s40_s22, 80  ;;  %s496_s1 = scalar_lea.vmem %s40_s22, 96 }
  0x1a   :  { %p493_p10 = scmp.ne.s32.totalorder %s40_s22, %s492_s26  ;;  %p497_p11 = scmp.lt.s32.totalorder %s40_s22, %s40_s22 }
  0x1b   :  { %p498_p12 = scmp.lt.s32.totalorder %s496_s1, %s492_s26 }
  0x1d   :  { %p499_p13 = por %p498_p12, %p497_p11 }
  0x1f   :  { %p500_p0 = pnand %p499_p13, %p493_p10 }
  0x21   :  { %503 = shalt.err (!%p500_p0)
}
  0x22   :  { %42 = dma.hbm_to_vmem [thread:$0]  %s586_s2, 80, %s40_s22, [#allocation7]  }
  0x23   :  { %524 = dma.done.wait [#allocation4], 128  }
  0x24   :  { %525 = vsyncadd [#allocation4], 4294967168 }
  0x25   :  { %526 = dma.done.wait [#allocation7], 2640  }
  0x26   :  { %527 = vsyncadd [#allocation7], 4294964656  ;;  %v535_v0 = vmov 0.0   ;;  %v83_v1 = vld [vmem:[#allocation6 + $0x80] sm:$0xff]  ;;  %v82_v2 = vld [vmem:[#allocation6 + $0x78] sm:$0xff]  ;;  %vm87_vm0 = vcmask 261120   ;;  %v323_v14 = vlaneseq }
  0x27   :  { %155 = vmatprep.mubr.f32.mxu0 %v535_v0  ;;  %226 = vmatprep.mubr.f32.mxu1 %v535_v0  ;;  %v78_v3 = vld [vmem:[#allocation6 + $0x58] sm:$0xff]  ;;  %v77_v4 = vld [vmem:[#allocation6 + $0x50] sm:$0xff]  ;;  %v72_v6 = vld [vmem:[#allocation6 + $0x28] sm:$0xff]  ;;  %vm536_vm1 = vmmov 0   ;;  %v537_v36 = vmov 2   ;;  %v538_v37 = vmov 0  }
  0x28   :  { %115 = vmatprep.subr.mxu0 %v83_v1  ;;  %v73_v5 = vld [vmem:[#allocation6 + $0x30] sm:$0xff]  ;;  %v68_v7 = vld [vmem:[#allocation6 + $0x8] sm:$0xff]  ;;  %v67_v8 = vld [vmem:[#allocation6] sm:$0xff]  ;;  %v573_v15 = vshrl.u32 %v323_v14, 7  ;;  %437 = vset.pattern.permute.xlu0 %v537_v36  ;;  %v539_v41 = vmov 1   ;;  %v540_v42 = vmov 3  }
  0x29   :  { %116 = vmatpush1.msra.mxu0 %v82_v2  ;;  %v66_v9 = vld [vmem:[#allocation3] sm:$0xff]  ;;  %v81_v11 = vld [vmem:[#allocation6 + $0x70] sm:$0xff]  ;;  %v76_v12 = vld [vmem:[#allocation6 + $0x48] sm:$0xff]  ;;  %435 = vset.pattern.permute.xlu1 %v538_v37  ;;  %s541_s0 = smov [#allocation9]  }
  0x2a   :  { %117 = vmatprep.subr.mxu0 %v78_v3  ;;  %v86_v10 = vld [vmem:[#allocation6 + $0x98] sm:$0xff]  ;;  %v71_v13 = vld [vmem:[#allocation6 + $0x20] sm:$0xff]  ;;  %v341_v16 = vsub.s32 4, %v573_v15  ;;  %v85_v24 = vld [vmem:[#allocation6 + $0x90] sm:$0xff]  ;;  %v325_v43 = vsub.s32 0, %v573_v15  ;;  %v329_v44 = vsub.s32 1, %v573_v15 }
  0x2b   :  { %118 = vmatpush1.msra.mxu0 %v77_v4  ;;  %v321_v18 = vld [vmem:[#allocation8] sm:$0x1f]  ;;  %v84_v25 = vld [vmem:[#allocation6 + $0x88] sm:$0xff]  ;;  %186 = vmatprep.subr.mxu1 %v85_v24  ;;  %v74_v29 = vld [vmem:[#allocation6 + $0x38] sm:$0xff]  ;;  %v333_v45 = vsub.s32 2, %v573_v15  ;;  %v337_v51 = vsub.s32 3, %v573_v15 }
  0x2c   :  { %119 = vmatprep.subr.mxu0 %v73_v5  ;;  %v342_v19 = vrot.slane %v321_v18, %v341_v16  ;;  %v80_v26 = vld [vmem:[#allocation6 + $0x68] sm:$0xff]  ;;  %v79_v27 = vld [vmem:[#allocation6 + $0x60] sm:$0xff]  ;;  %187 = vmatpush1.msra.mxu1 %v84_v25  ;;  %v70_v30 = vld [vmem:[#allocation6 + $0x18] sm:$0xff]  ;;  %v326_v46 = vrot.slane %v321_v18, %v325_v43  ;;  %v330_v47 = vrot.slane %v321_v18, %v329_v44  ;;  %s394_s2 = sshll.u32 %s541_s0, 4  ;;  %s395_s2 = int_to_ptr.vmem [resolvable:$true] %s394_s2 }
  0x2d   :  { %120 = vmatpush1.msra.mxu0 %v72_v6  ;;  %v75_v28 = vld [vmem:[#allocation6 + $0x40] sm:$0xff]  ;;  %188 = vmatprep.subr.mxu1 %v80_v26  ;;  %v69_v31 = vld [vmem:[#allocation6 + $0x10] sm:$0xff]  ;;  %v334_v48 = vrot.slane %v321_v18, %v333_v45  ;;  %v338_v57 = vrot.slane %v321_v18, %v337_v51  ;;  %s504_s29 = scalar_lea.vmem %s395_s2, 128  ;;  %p509_p2 = scmp.lt.s32.totalorder %s395_s2, %s395_s2 }
  0x2e   :  { %121 = vmatprep.subr.mxu0 %v68_v7  ;;  %189 = vmatpush1.msra.mxu1 %v79_v27  ;;  %p505_p1 = scmp.ne.s32.totalorder %s395_s2, %s504_s29  ;;  %p510_p3 = scmp.lt.s32.totalorder %s504_s29, %s504_s29 }
  0x2f   :  { %122 = vmatpush1.msra.mxu0 %v67_v8  ;;  %190 = vmatprep.subr.mxu1 %v75_v28 }
  0x30   :  { %404 = vmatmul.mubr.msk.f32.vlgmr.msra.gmra.mxu0 %vm87_vm0, %v66_v9  ;;  %412 = vmatprep.subr.mxu0 %v535_v0  ;;  %p511_p4 = por %p510_p3, %p509_p2 }
  0x31   :  { %413 = vmatpush3.msra.mxu0 %v86_v10  ;;  %420 = vmatprep.mubr.msk.f32.mxu0 %vm536_vm1, %v535_v0 }
  0x32   :  { %414 = vmatprep.subr.mxu0 %v535_v0  ;;  %191 = vmatpush1.msra.mxu1 %v74_v29  ;;  %p512_p5 = pnand %p511_p4, %p505_p1 }
  0x33   :  { %415 = vmatpush3.msra.mxu0 %v81_v11  ;;  %192 = vmatprep.subr.mxu1 %v70_v30 }
  0x34   :  { %416 = vmatprep.subr.mxu0 %v535_v0  ;;  %193 = vmatpush1.msra.mxu1 %v69_v31 }
  0x35   :  { %417 = vmatpush3.msra.mxu0 %v76_v12  ;;  %405 = vmatmul.mubr.msk.f32.vlgmr.msra.gmra.mxu1 %vm87_vm0, %v66_v9 }
  0x36   :  { %418 = vmatprep.subr.mxu0 %v535_v0 }
  0x37   :  { %419 = vmatpush3.msra.mxu0 %v71_v13 }
  0x38   :  { %421 = vmatmul.mubr.msk.f32.vlgmr.msra.gmra.mxu0 %vm87_vm0, %v66_v9 }
  0xf0   :  { %v157_v17 = vpop.f32.mrf.mxu0 }
  0xf1   :  { %v348_v52 = vadd.f32 %v326_v46, %v157_v17 }
  0xf2   :  { %v159_v20 = vpop.f32.mrf.mxu0 }
  0xf3   :  { %v349_v53 = vadd.f32 %v330_v47, %v159_v20 }
  0xf5   :  { %v228_v50 = vpop.f32.mrf.mxu1 }
  0xf6   :  { %v350_v54 = vadd.f32 %v334_v48, %v228_v50 }
  0xf7   :  { %v230_v60 = vpop.f32.mrf.mxu1 }
  0xf8   :  { %v299_v21 = vpop.f32.mrf.mxu0  ;;  %v351_v63 = vadd.f32 %v338_v57, %v230_v60 }
  0xf9   :  { %v352_v22 = vadd.f32 %v342_v19, %v299_v21 }
  0xfa   :  { %v422_v23 = vpop.f32.mrf.mxu0 }
  0xfb   :  { %353 = vmax.xlane.f32.xlu0 %v352_v22 }
 0x184   :  { %v354_v32 = vpop.xlane.xlu0 %353 }
 0x185   :  { %v355_v33 = vsub.f32 %v352_v22, %v354_v32 }
 0x187   :  { %v356_v34 = vmul.f32 1.442695, %v355_v33 }
 0x189   :  { %440 = vpow2.f32 %v356_v34 }
 0x196   :  { %v441_v35 = vpop.eup %440 }
 0x197   :  { %358 = vadd.xlane.f32.xlu0 %v441_v35 }
 0x220   :  { %v359_v38 = vpop.xlane.xlu0 %358 }
 0x221   :  { %442 = vrcp.f32 %v359_v38 }
 0x22e   :  { %v443_v39 = vpop.eup %442 }
 0x22f   :  { %v361_v40 = vmul.f32 %v443_v39, %v441_v35 }
 0x231   :  { %376 = vperm.xlu0 %437, %v361_v40   ;;  %364 = vperm.xlu1 %435, %v361_v40  }
 0x235   :  { %436 = vset.pattern.permute.xlu1 %v539_v41  ;;  %439 = vset.pattern.permute.xlu0 %v540_v42 }
 0x236   :  { %370 = vperm.xlu1 %436, %v361_v40  }
 0x23a   :  { %438 = vset.pattern.permute.xlu1 %v540_v42 }
 0x23b   :  { %382 = vperm.xlu1 %438, %v361_v40  }
 0x2ac   :  { %v365_v49 = vpop.permute.xlu1 %364  ;;  %v377_v55 = vpop.permute.xlu0 %376 }
 0x2ad   :  { %v367_v58 = vmul.f32 %v365_v49, %v348_v52  ;;  %v379_v61 = vmul.f32 %v377_v55, %v350_v54 }
 0x2b1   :  { %v371_v56 = vpop.permute.xlu1 %370 }
 0x2b2   :  { %v373_v59 = vmul.f32 %v371_v56, %v349_v53 }
 0x2b4   :  { %v374_v62 = vadd.f32 %v373_v59, %v367_v58 }
 0x2b6   :  { %v380_v0 = vadd.f32 %v379_v61, %v374_v62  ;;  %v383_v1 = vpop.permute.xlu1 %382 }
 0x2b7   :  { %v385_v2 = vmul.f32 %v383_v1, %v351_v63 }
 0x2b9   :  { %v386_v3 = vadd.f32 %v385_v2, %v380_v0 }
 0x2bb   :  { %387 = vst [vmem:[#allocation9] sm:$0xff] %v386_v3 }
 0x2bc   :  { %515 = shalt.err (!%p512_p5)
}
 0x2bd   :  { %397 = dma.vmem_to_hbm [thread:$0]  %s395_s2, 128, %s587_s3, [#allocation5]  }
 0x2be   :  { %528 = dma.done.wait [#allocation5], 128  }
 0x2bf   :  { %529 = vsyncadd [#allocation5], 4294967168 }
 0x2c0   :  { %401 = vsyncpa [#allocation4], 1 }
 0x2c1   :  { %402 = vsyncpa [#allocation7], 1 }
 0x2c2   :  { %403 = vsyncpa [#allocation5], 1 }

</bundles_post_ra>
